<compile_context>
chip_gen: v7x
topology: tpu7x:2x2x1
jax: 0.10.0
libtpu: 0.0.40
codegen_flags: <defaults>
</compile_context>

<pallas_src>
import numpy as np
import jax
import jax.numpy as jnp
from jax.experimental import pallas as pl
from jax.experimental.pallas import tpu as pltpu

# ---------------- config (small, consistent with the module) ----------------
B = 2              # batch (packed 2-per-row on the lane axis; assumes B == 2)
N = 16             # points per cloud
S = 8              # num_neighbors (n_sample)
RADIUS = 0.3
FEATURE_DIM = 16
RAW = 10           # xyz(3) + dxyz(3) + ppf(4)
C1 = FEATURE_DIM * 4   # prepool width  (feature_dim * 4) = 64
C2 = FEATURE_DIM * 2   # postpool width (feature_dim * 2) = 32
CPAD = C1              # padded per-point channel width (64)
LANES = 2 * CPAD       # packed row width (128): [batch0 | batch1]
BN_EPS = 1e-5

assert B == 2 and CPAD == 64 and S % 4 == 0 and N % 8 == 0


# ------------------------- glue: sample_and_group_multi ---------------------
def _angle(v1, v2):
    cross = jnp.cross(v1, v2)
    return jnp.arctan2(jnp.linalg.norm(cross, axis=-1), jnp.sum(v1 * v2, axis=-1))


def sample_and_group_multi(radius, nsample, xyz, normals):
    # TODO(synk): query_ball_point neighbor gather (pairwise dist + sort + take) kept in
    # plain JAX glue; data-dependent gather/sort has no clean Pallas path and neighbor
    # ordering may differ from the CUDA first-found implementation.
    b, n, _ = xyz.shape
    sqr = jnp.sum((xyz[:, :, None, :] - xyz[:, None, :, :]) ** 2, axis=-1)   # (B,N,N)
    idx = jnp.broadcast_to(jnp.arange(n), (b, n, n))
    idx = jnp.where(sqr > radius ** 2, n, idx)
    idx = jnp.sort(idx, axis=-1)[:, :, :nsample]
    first = idx[:, :, :1]
    idx = jnp.where(idx == n, first, idx)                                    # (B,N,S)
    gxyz = jax.vmap(lambda pts, i: pts[i])(xyz, idx)                         # (B,N,S,3)
    gnrm = jax.vmap(lambda nn_, i: nn_[i])(normals, idx)                     # (B,N,S,3)
    d = gxyz - xyz[:, :, None, :]
    nr = normals[:, :, None, :]
    ppf = jnp.stack(
        [_angle(nr, d), _angle(gnrm, d), _angle(nr, gnrm),
         jnp.linalg.norm(d, axis=-1)], axis=-1)                              # (B,N,S,4)
    return {'xyz': xyz, 'dxyz': d, 'ppf': ppf}


def build_raw_features(xyz, normals):
    feats = sample_and_group_multi(RADIUS, S, xyz, normals)
    center = jnp.broadcast_to(feats['xyz'][:, :, None, :], feats['dxyz'].shape)
    # concat order follows sorted(features, key=_raw_features_order): xyz, dxyz, ppf
    return jnp.concatenate([center, feats['dxyz'], feats['ppf']], axis=-1)   # (B,N,S,10)


# --------------------------- fused Pallas kernel -----------------------------
def _fused_kernel(x_ref, w_ref, b_ref, out_ref):
    # x_ref:   (S*N, 128)      s-major packed slab: row = s*N + n,
    #                          lanes [b*64:(b+1)*64] = (padded) features of batch b
    # w_ref:   (6, 128, 128)   block-diagonal folded conv weights
    # b_ref:   (6, 1, 128)     lane-duplicated folded conv biases
    # out_ref: (N+1, 128)      rows 0..N-1: packed point feats; row N: packed glob feats
    half = (S // 2) * N                      # 64 rows per independent half-chain

    # ---- prepool: three 1x1 convs (+folded BN) + ReLU, two independent
    #      64-row chains so the MXU drains of consecutive layers can overlap ----
    hA = x_ref[0:half]                       # neighbors s = 0..S/2-1
    hB = x_ref[half:2 * half]                # neighbors s = S/2..S-1
    for l in range(3):
        hA = jnp.maximum(
            jnp.dot(hA, w_ref[l], preferred_element_type=jnp.float32) + b_ref[l], 0.0)
        hB = jnp.maximum(
            jnp.dot(hB, w_ref[l], preferred_element_type=jnp.float32) + b_ref[l], 0.0)
    # Dropout(p=0.2) after layer 0: identity in eval mode.

    # ---- max over neighbors S (torch.max(features, 2)[0]): depth-3 tree reduce ----
    mA = jnp.maximum(hA[0:2 * N], hA[2 * N:4 * N])
    mA = jnp.maximum(mA[0:N], mA[N:2 * N])
    mB = jnp.maximum(hB[0:2 * N], hB[2 * N:4 * N])
    mB = jnp.maximum(mB[0:N], mB[N:2 * N])
    pooled = jnp.maximum(mA, mB)             # (N, 128)

    # ---- postpool: Conv1d+BN+ReLU, Conv1d+BN+ReLU, Conv1d (no BN / ReLU) ----
    g = pooled
    for l in range(3, 5):
        g = jnp.maximum(
            jnp.dot(g, w_ref[l], preferred_element_type=jnp.float32) + b_ref[l], 0.0)
    g = jnp.dot(g, w_ref[5], preferred_element_type=jnp.float32) + b_ref[5]

    # ---- combined output: point feats + per-batch global max (lane halves = batches) ----
    out_ref[0:N, :] = g
    out_ref[N:N + 1, :] = jnp.max(g, axis=0, keepdims=True)


def fused_feat_pallas(x_slab, w_slab, b_slab):
    # TODO(synk): at realistic RPMNet sizes (N~1k, S=64) replace grid=() with a tiled,
    # "parallel" point-axis grid (BlockSpec over rows) so VMEM stays bounded on v7x and
    # both TensorCores are used; at this toy size a single tile is optimal.
    return pl.pallas_call(
        _fused_kernel,
        out_shape=jax.ShapeDtypeStruct((N + 1, LANES), jnp.float32),
        in_specs=[pl.BlockSpec(memory_space=pltpu.MemorySpace.VMEM)] * 3,
        out_specs=pl.BlockSpec(memory_space=pltpu.MemorySpace.VMEM),
    )(x_slab, w_slab, b_slab)


# -------------------------- parameters (deterministic) ----------------------
_LAYER_DIMS = [(RAW, C1), (C1, C1), (C1, C1),   # prepool  (Conv2d 1x1 + BN)
               (C1, C1), (C1, C2), (C2, C2)]    # postpool (Conv1d+BN, Conv1d+BN, Conv1d)


def init_params(key):
    """Conv weights as (in, out) for channels-last matmuls; separate (unfolded) BN params."""
    def conv_init(k, fan_in, fan_out):
        k1, k2 = jax.random.split(k)
        bound = 1.0 / np.sqrt(fan_in)
        w = jax.random.uniform(k1, (fan_in, fan_out), jnp.float32, -bound, bound)
        b = jax.random.uniform(k2, (fan_out,), jnp.float32, -bound, bound)
        return w, b

    def bn_init(k, dim):
        k1, k2, k3, k4 = jax.random.split(k, 4)
        gamma = jax.random.uniform(k1, (dim,), jnp.float32, 0.5, 1.5)
        beta = 0.1 * jax.random.normal(k2, (dim,), jnp.float32)
        mean = 0.1 * jax.random.normal(k3, (dim,), jnp.float32)
        var = jax.random.uniform(k4, (dim,), jnp.float32, 0.5, 1.5)
        return gamma, beta, mean, var

    keys = jax.random.split(key, 2 * len(_LAYER_DIMS))
    conv_params, bn_params = [], []
    for i, (fi, fo) in enumerate(_LAYER_DIMS):
        conv_params.append(conv_init(keys[2 * i], fi, fo))
        bn_params.append(bn_init(keys[2 * i + 1], fo) if i != 5 else None)  # last conv: no BN
    return conv_params, bn_params
    # TODO(synk): global_postpool is constructed in __init__ but never used in forward -> omitted.


def fold_params(conv_params, bn_params):
    """Fold eval-mode BatchNorm into the preceding 1x1 conv."""
    folded = []
    for (w, b), bn in zip(conv_params, bn_params):
        if bn is None:
            folded.append((w, b))
        else:
            gamma, beta, mean, var = bn
            scale = gamma / jnp.sqrt(var + BN_EPS)
            folded.append((w * scale[None, :], (b - mean) * scale + beta))
    return folded


def pack_params(folded):
    """Zero-pad each layer to (64,64)/(64,), duplicate block-diagonally to 128 lanes,
    and stack into (6,128,128) / (6,1,128) slabs (built ONCE, device-resident).

    Padding is exact: padded weight rows/cols and padded bias lanes are zero, so every
    padded activation lane stays zero through ReLU and the final (bias-only) layer.
    """
    Ws, Bs = [], []
    for (w, b), (fi, fo) in zip(folded, _LAYER_DIMS):
        wp = jnp.zeros((CPAD, CPAD), jnp.float32).at[:fi, :fo].set(w)
        bp = jnp.zeros((CPAD,), jnp.float32).at[:fo].set(b)
        wd = (jnp.zeros((LANES, LANES), jnp.float32)
              .at[:CPAD, :CPAD].set(wp)
              .at[CPAD:, CPAD:].set(wp))
        bd = jnp.concatenate([bp, bp])[None, :]
        Ws.append(wd)
        Bs.append(bd)
    return jnp.stack(Ws), jnp.stack(Bs)        # (6, 128, 128), (6, 1, 128)


# ------------------------------ forward --------------------------------------
@jax.jit
def feat_extraction_forward(xyz, normals, w_slab, b_slab):
    raw = build_raw_features(xyz, normals)                       # (B, N, S, 10)
    # lane-dense packing (wrapper-side layout plumbing, fused by XLA under jit):
    # row = s*N + n, lanes [b*64:(b+1)*64] = padded raw features of (b, n, s).
    xt = jnp.transpose(raw, (2, 1, 0, 3))                        # (S, N, B, 10)
    xt = jnp.pad(xt, ((0, 0), (0, 0), (0, 0), (0, CPAD - RAW)))  # (S, N, B, 64)
    x = xt.reshape(S * N, LANES)                                 # (128, 128)

    out = fused_feat_pallas(x, w_slab, b_slab)                   # (N+1, 128)
    pf_packed = out[:N]                                          # (N, 128)
    gf_packed = out[N]                                           # (128,)
    point_feat = jnp.transpose(
        pf_packed.reshape(N, B, CPAD)[:, :, :C2], (1, 0, 2))     # (B, N, C2)
    glob_feat = gf_packed.reshape(B, CPAD)[:, :C2]               # (B, C2)
    # matches torch: (glob_feat (B, 2*feature_dim), point_feat (B, N, 2*feature_dim))
    return glob_feat, point_feat


# ------------------- pure-JAX reference (UNFOLDED BatchNorm) -----------------
def _apply_bn(x, bn):
    gamma, beta, mean, var = bn
    return (x - mean) / jnp.sqrt(var + BN_EPS) * gamma + beta


def reference_forward(raw, conv_params, bn_params):
    h = raw                                                      # (B, N, S, 10)
    for l in range(3):
        w, b = conv_params[l]
        h = jnp.maximum(_apply_bn(h @ w + b, bn_params[l]), 0.0)
    pooled = jnp.max(h, axis=2)                                  # (B, N, C1)
    g = pooled
    for l in range(3, 5):
        w, b = conv_params[l]
        g = jnp.maximum(_apply_bn(g @ w + b, bn_params[l]), 0.0)
    w, b = conv_params[5]
    g = g @ w + b                                                # (B, N, C2)
    return jnp.max(g, axis=1), g


# -------------------------------- main ---------------------------------------
if __name__ == "__main__":
    key = jax.random.PRNGKey(0)
    kx, kn, kp = jax.random.split(key, 3)
    xyz = jax.random.uniform(kx, (B, N, 3), jnp.float32)
    normals = jax.random.normal(kn, (B, N, 3), jnp.float32)
    normals = normals / jnp.linalg.norm(normals, axis=-1, keepdims=True)

    conv_params, bn_params = init_params(kp)
    # hoisted out of the per-call path: built once, stays device-resident.
    w_slab, b_slab = pack_params(fold_params(conv_params, bn_params))
    w_slab, b_slab = jax.device_put(w_slab), jax.device_put(b_slab)

    glob_feat, point_feat = feat_extraction_forward(xyz, normals, w_slab, b_slab)
    glob_feat = jax.block_until_ready(glob_feat)
    point_feat = jax.block_until_ready(point_feat)

    # correctness check against a pure-JAX reference with UNFOLDED BatchNorm
    raw = build_raw_features(xyz, normals)
    ref_glob, ref_point = reference_forward(raw, conv_params, bn_params)
    assert glob_feat.shape == (B, C2) and point_feat.shape == (B, N, C2)
    assert jnp.allclose(glob_feat, ref_glob, atol=1e-4, rtol=1e-4)
    assert jnp.allclose(point_feat, ref_point, atol=1e-4, rtol=1e-4)
    print("KERNEL_OK")
</pallas_src>

<mosaic_0001>
module attributes {stable_mosaic.version = 11 : i64} {
  func.func @_fused_kernel(%arg0: memref<128x128xf32, #tpu.memory_space<vmem>>, %arg1: memref<6x128x128xf32, #tpu.memory_space<vmem>>, %arg2: memref<6x1x128xf32, #tpu.memory_space<vmem>>, %arg3: memref<17x128xf32, #tpu.memory_space<vmem>>) attributes {dimension_semantics = [], scalar_prefetch = 0 : i64, scratch_operands = 0 : i64, tpu.core_type = #tpu.core_type<tc>} {
    %c0 = arith.constant 0 : index
    %c0_0 = arith.constant 0 : index
    %0 = vector.load %arg0[%c0, %c0_0] : memref<128x128xf32, #tpu.memory_space<vmem>>, vector<64x128xf32>
    %c64 = arith.constant 64 : index
    %c0_1 = arith.constant 0 : index
    %1 = vector.load %arg0[%c64, %c0_1] : memref<128x128xf32, #tpu.memory_space<vmem>>, vector<64x128xf32>
    %c0_2 = arith.constant 0 : index
    %c0_3 = arith.constant 0 : index
    %c0_4 = arith.constant 0 : index
    %2 = vector.load %arg1[%c0_2, %c0_3, %c0_4] : memref<6x128x128xf32, #tpu.memory_space<vmem>>, vector<1x128x128xf32>
    %3 = vector.shape_cast %2 : vector<1x128x128xf32> to vector<128x128xf32>
    %cst = arith.constant dense<0.000000e+00> : vector<64x128xf32>
    %4 = tpu.matmul %0, %3, %cst {dimension_numbers = #tpu.dot_dimension_numbers<[1], [0], [0], [1], [0, 0, 1, 1], [], []>} : vector<64x128xf32>, vector<128x128xf32>, vector<64x128xf32> -> vector<64x128xf32>
    %c0_5 = arith.constant 0 : index
    %c0_6 = arith.constant 0 : index
    %c0_7 = arith.constant 0 : index
    %5 = vector.load %arg2[%c0_5, %c0_6, %c0_7] : memref<6x1x128xf32, #tpu.memory_space<vmem>>, vector<1x1x128xf32>
    %6 = vector.shape_cast %5 : vector<1x1x128xf32> to vector<1x128xf32>
    %7 = vector.broadcast %6 : vector<1x128xf32> to vector<64x128xf32>
    %8 = arith.addf %4, %7 : vector<64x128xf32>
    %cst_8 = arith.constant 0.000000e+00 : f32
    %9 = vector.broadcast %cst_8 : f32 to vector<64x128xf32>
    %10 = arith.maximumf %8, %9 : vector<64x128xf32>
    %c0_9 = arith.constant 0 : index
    %c0_10 = arith.constant 0 : index
    %c0_11 = arith.constant 0 : index
    %11 = vector.load %arg1[%c0_9, %c0_10, %c0_11] : memref<6x128x128xf32, #tpu.memory_space<vmem>>, vector<1x128x128xf32>
    %12 = vector.shape_cast %11 : vector<1x128x128xf32> to vector<128x128xf32>
    %cst_12 = arith.constant dense<0.000000e+00> : vector<64x128xf32>
    %13 = tpu.matmul %1, %12, %cst_12 {dimension_numbers = #tpu.dot_dimension_numbers<[1], [0], [0], [1], [0, 0, 1, 1], [], []>} : vector<64x128xf32>, vector<128x128xf32>, vector<64x128xf32> -> vector<64x128xf32>
    %c0_13 = arith.constant 0 : index
    %c0_14 = arith.constant 0 : index
    %c0_15 = arith.constant 0 : index
    %14 = vector.load %arg2[%c0_13, %c0_14, %c0_15] : memref<6x1x128xf32, #tpu.memory_space<vmem>>, vector<1x1x128xf32>
    %15 = vector.shape_cast %14 : vector<1x1x128xf32> to vector<1x128xf32>
    %16 = vector.broadcast %15 : vector<1x128xf32> to vector<64x128xf32>
    %17 = arith.addf %13, %16 : vector<64x128xf32>
    %cst_16 = arith.constant 0.000000e+00 : f32
    %18 = vector.broadcast %cst_16 : f32 to vector<64x128xf32>
    %19 = arith.maximumf %17, %18 : vector<64x128xf32>
    %c1 = arith.constant 1 : index
    %c0_17 = arith.constant 0 : index
    %c0_18 = arith.constant 0 : index
    %20 = vector.load %arg1[%c1, %c0_17, %c0_18] : memref<6x128x128xf32, #tpu.memory_space<vmem>>, vector<1x128x128xf32>
    %21 = vector.shape_cast %20 : vector<1x128x128xf32> to vector<128x128xf32>
    %cst_19 = arith.constant dense<0.000000e+00> : vector<64x128xf32>
    %22 = tpu.matmul %10, %21, %cst_19 {dimension_numbers = #tpu.dot_dimension_numbers<[1], [0], [0], [1], [0, 0, 1, 1], [], []>} : vector<64x128xf32>, vector<128x128xf32>, vector<64x128xf32> -> vector<64x128xf32>
    %c1_20 = arith.constant 1 : index
    %c0_21 = arith.constant 0 : index
    %c0_22 = arith.constant 0 : index
    %23 = vector.load %arg2[%c1_20, %c0_21, %c0_22] : memref<6x1x128xf32, #tpu.memory_space<vmem>>, vector<1x1x128xf32>
    %24 = vector.shape_cast %23 : vector<1x1x128xf32> to vector<1x128xf32>
    %25 = vector.broadcast %24 : vector<1x128xf32> to vector<64x128xf32>
    %26 = arith.addf %22, %25 : vector<64x128xf32>
    %cst_23 = arith.constant 0.000000e+00 : f32
    %27 = vector.broadcast %cst_23 : f32 to vector<64x128xf32>
    %28 = arith.maximumf %26, %27 : vector<64x128xf32>
    %c1_24 = arith.constant 1 : index
    %c0_25 = arith.constant 0 : index
    %c0_26 = arith.constant 0 : index
    %29 = vector.load %arg1[%c1_24, %c0_25, %c0_26] : memref<6x128x128xf32, #tpu.memory_space<vmem>>, vector<1x128x128xf32>
    %30 = vector.shape_cast %29 : vector<1x128x128xf32> to vector<128x128xf32>
    %cst_27 = arith.constant dense<0.000000e+00> : vector<64x128xf32>
    %31 = tpu.matmul %19, %30, %cst_27 {dimension_numbers = #tpu.dot_dimension_numbers<[1], [0], [0], [1], [0, 0, 1, 1], [], []>} : vector<64x128xf32>, vector<128x128xf32>, vector<64x128xf32> -> vector<64x128xf32>
    %c1_28 = arith.constant 1 : index
    %c0_29 = arith.constant 0 : index
    %c0_30 = arith.constant 0 : index
    %32 = vector.load %arg2[%c1_28, %c0_29, %c0_30] : memref<6x1x128xf32, #tpu.memory_space<vmem>>, vector<1x1x128xf32>
    %33 = vector.shape_cast %32 : vector<1x1x128xf32> to vector<1x128xf32>
    %34 = vector.broadcast %33 : vector<1x128xf32> to vector<64x128xf32>
    %35 = arith.addf %31, %34 : vector<64x128xf32>
    %cst_31 = arith.constant 0.000000e+00 : f32
    %36 = vector.broadcast %cst_31 : f32 to vector<64x128xf32>
    %37 = arith.maximumf %35, %36 : vector<64x128xf32>
    %c2 = arith.constant 2 : index
    %c0_32 = arith.constant 0 : index
    %c0_33 = arith.constant 0 : index
    %38 = vector.load %arg1[%c2, %c0_32, %c0_33] : memref<6x128x128xf32, #tpu.memory_space<vmem>>, vector<1x128x128xf32>
    %39 = vector.shape_cast %38 : vector<1x128x128xf32> to vector<128x128xf32>
    %cst_34 = arith.constant dense<0.000000e+00> : vector<64x128xf32>
    %40 = tpu.matmul %28, %39, %cst_34 {dimension_numbers = #tpu.dot_dimension_numbers<[1], [0], [0], [1], [0, 0, 1, 1], [], []>} : vector<64x128xf32>, vector<128x128xf32>, vector<64x128xf32> -> vector<64x128xf32>
    %c2_35 = arith.constant 2 : index
    %c0_36 = arith.constant 0 : index
    %c0_37 = arith.constant 0 : index
    %41 = vector.load %arg2[%c2_35, %c0_36, %c0_37] : memref<6x1x128xf32, #tpu.memory_space<vmem>>, vector<1x1x128xf32>
    %42 = vector.shape_cast %41 : vector<1x1x128xf32> to vector<1x128xf32>
    %43 = vector.broadcast %42 : vector<1x128xf32> to vector<64x128xf32>
    %44 = arith.addf %40, %43 : vector<64x128xf32>
    %cst_38 = arith.constant 0.000000e+00 : f32
    %45 = vector.broadcast %cst_38 : f32 to vector<64x128xf32>
    %46 = arith.maximumf %44, %45 : vector<64x128xf32>
    %c2_39 = arith.constant 2 : index
    %c0_40 = arith.constant 0 : index
    %c0_41 = arith.constant 0 : index
    %47 = vector.load %arg1[%c2_39, %c0_40, %c0_41] : memref<6x128x128xf32, #tpu.memory_space<vmem>>, vector<1x128x128xf32>
    %48 = vector.shape_cast %47 : vector<1x128x128xf32> to vector<128x128xf32>
    %cst_42 = arith.constant dense<0.000000e+00> : vector<64x128xf32>
    %49 = tpu.matmul %37, %48, %cst_42 {dimension_numbers = #tpu.dot_dimension_numbers<[1], [0], [0], [1], [0, 0, 1, 1], [], []>} : vector<64x128xf32>, vector<128x128xf32>, vector<64x128xf32> -> vector<64x128xf32>
    %c2_43 = arith.constant 2 : index
    %c0_44 = arith.constant 0 : index
    %c0_45 = arith.constant 0 : index
    %50 = vector.load %arg2[%c2_43, %c0_44, %c0_45] : memref<6x1x128xf32, #tpu.memory_space<vmem>>, vector<1x1x128xf32>
    %51 = vector.shape_cast %50 : vector<1x1x128xf32> to vector<1x128xf32>
    %52 = vector.broadcast %51 : vector<1x128xf32> to vector<64x128xf32>
    %53 = arith.addf %49, %52 : vector<64x128xf32>
    %cst_46 = arith.constant 0.000000e+00 : f32
    %54 = vector.broadcast %cst_46 : f32 to vector<64x128xf32>
    %55 = arith.maximumf %53, %54 : vector<64x128xf32>
    %56 = vector.extract_strided_slice %46 {offsets = [0, 0], sizes = [32, 128], strides = [1, 1]} : vector<64x128xf32> to vector<32x128xf32>
    %57 = vector.extract_strided_slice %46 {offsets = [32, 0], sizes = [32, 128], strides = [1, 1]} : vector<64x128xf32> to vector<32x128xf32>
    %58 = arith.maximumf %56, %57 : vector<32x128xf32>
    %59 = vector.extract_strided_slice %58 {offsets = [0, 0], sizes = [16, 128], strides = [1, 1]} : vector<32x128xf32> to vector<16x128xf32>
    %60 = vector.extract_strided_slice %58 {offsets = [16, 0], sizes = [16, 128], strides = [1, 1]} : vector<32x128xf32> to vector<16x128xf32>
    %61 = arith.maximumf %59, %60 : vector<16x128xf32>
    %62 = vector.extract_strided_slice %55 {offsets = [0, 0], sizes = [32, 128], strides = [1, 1]} : vector<64x128xf32> to vector<32x128xf32>
    %63 = vector.extract_strided_slice %55 {offsets = [32, 0], sizes = [32, 128], strides = [1, 1]} : vector<64x128xf32> to vector<32x128xf32>
    %64 = arith.maximumf %62, %63 : vector<32x128xf32>
    %65 = vector.extract_strided_slice %64 {offsets = [0, 0], sizes = [16, 128], strides = [1, 1]} : vector<32x128xf32> to vector<16x128xf32>
    %66 = vector.extract_strided_slice %64 {offsets = [16, 0], sizes = [16, 128], strides = [1, 1]} : vector<32x128xf32> to vector<16x128xf32>
    %67 = arith.maximumf %65, %66 : vector<16x128xf32>
    %68 = arith.maximumf %61, %67 : vector<16x128xf32>
    %c3 = arith.constant 3 : index
    %c0_47 = arith.constant 0 : index
    %c0_48 = arith.constant 0 : index
    %69 = vector.load %arg1[%c3, %c0_47, %c0_48] : memref<6x128x128xf32, #tpu.memory_space<vmem>>, vector<1x128x128xf32>
    %70 = vector.shape_cast %69 : vector<1x128x128xf32> to vector<128x128xf32>
    %cst_49 = arith.constant dense<0.000000e+00> : vector<16x128xf32>
    %71 = tpu.matmul %68, %70, %cst_49 {dimension_numbers = #tpu.dot_dimension_numbers<[1], [0], [0], [1], [0, 0, 1, 1], [], []>} : vector<16x128xf32>, vector<128x128xf32>, vector<16x128xf32> -> vector<16x128xf32>
    %c3_50 = arith.constant 3 : index
    %c0_51 = arith.constant 0 : index
    %c0_52 = arith.constant 0 : index
    %72 = vector.load %arg2[%c3_50, %c0_51, %c0_52] : memref<6x1x128xf32, #tpu.memory_space<vmem>>, vector<1x1x128xf32>
    %73 = vector.shape_cast %72 : vector<1x1x128xf32> to vector<1x128xf32>
    %74 = vector.broadcast %73 : vector<1x128xf32> to vector<16x128xf32>
    %75 = arith.addf %71, %74 : vector<16x128xf32>
    %cst_53 = arith.constant 0.000000e+00 : f32
    %76 = vector.broadcast %cst_53 : f32 to vector<16x128xf32>
    %77 = arith.maximumf %75, %76 : vector<16x128xf32>
    %c4 = arith.constant 4 : index
    %c0_54 = arith.constant 0 : index
    %c0_55 = arith.constant 0 : index
    %78 = vector.load %arg1[%c4, %c0_54, %c0_55] : memref<6x128x128xf32, #tpu.memory_space<vmem>>, vector<1x128x128xf32>
    %79 = vector.shape_cast %78 : vector<1x128x128xf32> to vector<128x128xf32>
    %cst_56 = arith.constant dense<0.000000e+00> : vector<16x128xf32>
    %80 = tpu.matmul %77, %79, %cst_56 {dimension_numbers = #tpu.dot_dimension_numbers<[1], [0], [0], [1], [0, 0, 1, 1], [], []>} : vector<16x128xf32>, vector<128x128xf32>, vector<16x128xf32> -> vector<16x128xf32>
    %c4_57 = arith.constant 4 : index
    %c0_58 = arith.constant 0 : index
    %c0_59 = arith.constant 0 : index
    %81 = vector.load %arg2[%c4_57, %c0_58, %c0_59] : memref<6x1x128xf32, #tpu.memory_space<vmem>>, vector<1x1x128xf32>
    %82 = vector.shape_cast %81 : vector<1x1x128xf32> to vector<1x128xf32>
    %83 = vector.broadcast %82 : vector<1x128xf32> to vector<16x128xf32>
    %84 = arith.addf %80, %83 : vector<16x128xf32>
    %cst_60 = arith.constant 0.000000e+00 : f32
    %85 = vector.broadcast %cst_60 : f32 to vector<16x128xf32>
    %86 = arith.maximumf %84, %85 : vector<16x128xf32>
    %c5 = arith.constant 5 : index
    %c0_61 = arith.constant 0 : index
    %c0_62 = arith.constant 0 : index
    %87 = vector.load %arg1[%c5, %c0_61, %c0_62] : memref<6x128x128xf32, #tpu.memory_space<vmem>>, vector<1x128x128xf32>
    %88 = vector.shape_cast %87 : vector<1x128x128xf32> to vector<128x128xf32>
    %cst_63 = arith.constant dense<0.000000e+00> : vector<16x128xf32>
    %89 = tpu.matmul %86, %88, %cst_63 {dimension_numbers = #tpu.dot_dimension_numbers<[1], [0], [0], [1], [0, 0, 1, 1], [], []>} : vector<16x128xf32>, vector<128x128xf32>, vector<16x128xf32> -> vector<16x128xf32>
    %c5_64 = arith.constant 5 : index
    %c0_65 = arith.constant 0 : index
    %c0_66 = arith.constant 0 : index
    %90 = vector.load %arg2[%c5_64, %c0_65, %c0_66] : memref<6x1x128xf32, #tpu.memory_space<vmem>>, vector<1x1x128xf32>
    %91 = vector.shape_cast %90 : vector<1x1x128xf32> to vector<1x128xf32>
    %92 = vector.broadcast %91 : vector<1x128xf32> to vector<16x128xf32>
    %93 = arith.addf %89, %92 : vector<16x128xf32>
    %c0_67 = arith.constant 0 : index
    %c0_68 = arith.constant 0 : index
    %94 = vector.load %arg3[%c0_67, %c0_68] : memref<17x128xf32, #tpu.memory_space<vmem>>, vector<16x128xf32>
    tpu.vector_store %arg3[%c0_67, %c0_68], %93 {strides = array<i32>} : memref<17x128xf32, #tpu.memory_space<vmem>>, vector<16x128xf32>,
    %cst_69 = arith.constant dense<0xFF800000> : vector<128xf32>
    %95 = vector.multi_reduction <maximumf>, %93, %cst_69 [0] : vector<16x128xf32> to vector<128xf32>
    %96 = vector.shape_cast %95 : vector<128xf32> to vector<1x128xf32>
    %c16 = arith.constant 16 : index
    %c0_70 = arith.constant 0 : index
    %97 = vector.load %arg3[%c16, %c0_70] : memref<17x128xf32, #tpu.memory_space<vmem>>, vector<1x128xf32>
    tpu.vector_store %arg3[%c16, %c0_70], %96 {strides = array<i32>} : memref<17x128xf32, #tpu.memory_space<vmem>>, vector<1x128xf32>,
    return
  }
}

</mosaic_0001>

<bundles_post_ra>
// kernel: squeeze.25
= control target key start
LH: loop header
LB: loop body
LE: loop exit
PB: predicated region body
PF: predicated region fallthrough
CT: control target
= control target key end

     0   :  { %s85_s0 = inlined_call_operand.vmem [shape: f32[128], index: 0, kind: input, shape index: {}]   ;;  %s86_s1 = inlined_call_operand.hbm [shape: f32[2,64], index: 1, kind: output, shape index: {}]  }
   0x1   :  { %v5_v0 = vld [vmem:[%s85_s0] sm:$0x1] }
   0x2   :  { %2 = vsyncpa [#allocation1], 0  ;;  %6 = vst [vmem:[#allocation3] sm:$0x1] %v5_v0  ;;  %vm8_vm0 = vcmask 523264   ;;  %s58_s0 = smov 64  }
   0x3   :  { %s59_s8 = smov [#allocation0]  }
   0x4   :  { %s26_s9 = sshll.u32 %s59_s8, 4  ;;  %s27_s9 = int_to_ptr.vmem [resolvable:$true] %s26_s9 }
   0x5   :  { %s34_s10 = scalar_lea.vmem %s27_s9, 32  ;;  %p39_p1 = scmp.lt.s32.totalorder %s27_s9, %s27_s9 }
   0x6   :  { %p35_p0 = scmp.ne.s32.totalorder %s27_s9, %s34_s10  ;;  %p40_p2 = scmp.lt.s32.totalorder %s34_s10, %s34_s10 }
   0x8   :  { %p41_p3 = por %p40_p2, %p39_p1 }
   0x9   :  { %v10_v1 = vld [vmem:[#allocation3] sm:$0x1]  }
   0xa   :  { %v7_v2 = vld [vmem:[#allocation3] sm:$0x1]   ;;  %11 = vrot.lane.b32.xlu0 %v10_v1, %s58_s0  ;;  %p42_p4 = pnand %p41_p3, %p35_p0 }
   0xb   :  { %9 = vst.msk [vmem:[#allocation2] sm:$0x1] %vm8_vm0, %v7_v2  }
  0x7c   :  { %v12_v3 = vpop.permute.xlu0 %11  }
  0x7d   :  { %15 = vst.msk [vmem:[#allocation2 + $0x1] sm:$0x1] %vm8_vm0, %v12_v3  }
  0x84   :  { %v19_v4 = vld [vmem:[#allocation2] sm:$0x3] }
  0x85   :  { %21 = vst [vmem:[#allocation0] sm:$0x3] %v19_v4 }
  0x86   :  { %45 = shalt.err (!%p42_p4)
}
  0x87   :  { %s46_s13 = scalar_lea.hbm %s86_s1, 32 }
  0x88   :  { %p47_p5 = scmp.ne.s32.totalorder %s86_s1, %s46_s13  ;;  %p50_p6 = scmp.lt.u32.totalorder %s46_s13, %s86_s1 }
  0x8a   :  { %p52_p7 = pnand %p50_p6, %p47_p5 }
  0x8c   :  { %55 = shalt.err (!%p52_p7)
}
  0x8d   :  { %29 = dma.vmem_to_hbm [thread:$0]  %s27_s9, 32, %s86_s1, [#allocation1]  }
  0x8e   :  { %56 = dma.done.wait [#allocation1], 32  }
  0x8f   :  { %57 = vsyncadd [#allocation1], 4294967264 }
  0x90   :  { %31 = vsyncpa [#allocation1], 1 }

// kernel: feat_extraction_forward.1
= control target key start
LH: loop header
LB: loop body
LE: loop exit
PB: predicated region body
PF: predicated region fallthrough
CT: control target
= control target key end

     0   :  { %s2460_s1 = inlined_call_operand.vmem [shape: f32[6,128,128], index: 1, kind: input, shape index: {}]   ;;  %s2461_s0 = inlined_call_operand.vmem [shape: f32[128,128], index: 0, kind: input, shape index: {}]   ;;  %s2462_s2 = inlined_call_operand.vmem [shape: f32[6,1,128], index: 2, kind: input, shape index: {}]   ;;  %s2463_s3 = inlined_call_operand.vmem [shape: f32[17,128], index: 3, kind: output, shape index: {}]  }
   0x1   :  { %v30_v0 = vld [vmem:[%s2460_s1] sm:$0xff]  ;;  %v31_v1 = vld [vmem:[%s2460_s1 + $0x8] sm:$0xff]  ;;  %v32_v2 = vld [vmem:[%s2460_s1 + $0x10] sm:$0xff] }
   0x2   :  { %v1771_v3 = vpack.c.bf16 %v31_v1, %v30_v0  ;;  %v33_v4 = vld [vmem:[%s2460_s1 + $0x18] sm:$0xff]  ;;  %v34_v6 = vld [vmem:[%s2460_s1 + $0x20] sm:$0xff]  ;;  %v35_v7 = vld [vmem:[%s2460_s1 + $0x28] sm:$0xff] }
   0x3   :  { %v1775_v5 = vpack.c.bf16 %v33_v4, %v32_v2  ;;  %v1779_v8 = vpack.c.bf16 %v35_v7, %v34_v6  ;;  %v14_v9 = vld [vmem:[%s2461_s0] sm:$0xff]  ;;  %v36_v11 = vld [vmem:[%s2460_s1 + $0x30] sm:$0xff]  ;;  %v37_v12 = vld [vmem:[%s2460_s1 + $0x38] sm:$0xff] }
   0x4   :  { %1772 = vmatprep.subr.bf16.mxu0 %v1771_v3  ;;  %1804 = vmatprep.subr.bf16.mxu1 %v1771_v3  ;;  %v22_v10 = vld [vmem:[%s2461_s0 + $0x40] sm:$0xff]  ;;  %v1783_v13 = vpack.c.bf16 %v37_v12, %v36_v11  ;;  %v39_v15 = vld [vmem:[%s2460_s1 + $0x48] sm:$0xff]  ;;  %v40_v17 = vld [vmem:[%s2460_s1 + $0x50] sm:$0xff] }
   0x5   :  { %1774 = vmatpush3.bf16.msra.mxu0 %v1771_v3  ;;  %1806 = vmatpush3.bf16.msra.mxu1 %v1771_v3  ;;  %v38_v14 = vld [vmem:[%s2460_s1 + $0x40] sm:$0xff]  ;;  %v41_v18 = vld [vmem:[%s2460_s1 + $0x58] sm:$0xff]  ;;  %v43_v21 = vld [vmem:[%s2460_s1 + $0x68] sm:$0xff] }
   0x6   :  { %1776 = vmatprep.subr.bf16.mxu0 %v1775_v5  ;;  %1808 = vmatprep.subr.bf16.mxu1 %v1775_v5  ;;  %v1787_v16 = vpack.c.bf16 %v39_v15, %v38_v14  ;;  %v1791_v19 = vpack.c.bf16 %v41_v18, %v40_v17  ;;  %v42_v20 = vld [vmem:[%s2460_s1 + $0x60] sm:$0xff]  ;;  %v44_v23 = vld [vmem:[%s2460_s1 + $0x70] sm:$0xff]  ;;  %v45_v24 = vld [vmem:[%s2460_s1 + $0x78] sm:$0xff] }
   0x7   :  { %1434 = vmatprep.mubr.f32.mxu0 %v14_v9  ;;  %1478 = vmatprep.mubr.f32.mxu1 %v22_v10  ;;  %v1795_v22 = vpack.c.bf16 %v43_v21, %v42_v20  ;;  %v1799_v25 = vpack.c.bf16 %v45_v24, %v44_v23  ;;  %v1114_v26 = vld [vmem:[%s2460_s1 + $0x80] sm:$0xff]  ;;  %v1115_v27 = vld [vmem:[%s2460_s1 + $0x88] sm:$0xff]  ;;  %v1116_v29 = vld [vmem:[%s2460_s1 + $0x90] sm:$0xff] }
   0x8   :  { %v1835_v28 = vpack.c.bf16 %v1115_v27, %v1114_v26  ;;  %v1117_v30 = vld [vmem:[%s2460_s1 + $0x98] sm:$0xff]  ;;  %v15_v31 = vld [vmem:[%s2461_s0 + $0x8] sm:$0xff]  ;;  %v16_v33 = vld [vmem:[%s2461_s0 + $0x10] sm:$0xff] }
   0x9   :  { %1778 = vmatpush3.bf16.msra.mxu0 %v1775_v5  ;;  %1810 = vmatpush3.bf16.msra.mxu1 %v1775_v5  ;;  %v23_v32 = vld [vmem:[%s2461_s0 + $0x48] sm:$0xff]  ;;  %v24_v34 = vld [vmem:[%s2461_s0 + $0x50] sm:$0xff]  ;;  %v1839_v35 = vpack.c.bf16 %v1117_v30, %v1116_v29  ;;  %v1118_v36 = vld [vmem:[%s2460_s1 + $0xa0] sm:$0xff] }
   0xa   :  { %1780 = vmatprep.subr.bf16.mxu0 %v1779_v8  ;;  %1812 = vmatprep.subr.bf16.mxu1 %v1779_v8  ;;  %v1119_v37 = vld [vmem:[%s2460_s1 + $0xa8] sm:$0xff]  ;;  %v17_v38 = vld [vmem:[%s2461_s0 + $0x18] sm:$0xff]  ;;  %v18_v40 = vld [vmem:[%s2461_s0 + $0x20] sm:$0xff] }
   0xb   :  { %v25_v39 = vld [vmem:[%s2461_s0 + $0x58] sm:$0xff]  ;;  %v26_v41 = vld [vmem:[%s2461_s0 + $0x60] sm:$0xff]  ;;  %v1843_v42 = vpack.c.bf16 %v1119_v37, %v1118_v36  ;;  %v1120_v43 = vld [vmem:[%s2460_s1 + $0xb0] sm:$0xff] }
   0xc   :  { %v1121_v44 = vld [vmem:[%s2460_s1 + $0xb8] sm:$0xff]  ;;  %v19_v45 = vld [vmem:[%s2461_s0 + $0x28] sm:$0xff]  ;;  %v20_v47 = vld [vmem:[%s2461_s0 + $0x30] sm:$0xff] }
   0xd   :  { %1782 = vmatpush3.bf16.msra.mxu0 %v1779_v8  ;;  %1814 = vmatpush3.bf16.msra.mxu1 %v1779_v8  ;;  %v27_v46 = vld [vmem:[%s2461_s0 + $0x68] sm:$0xff]  ;;  %v28_v48 = vld [vmem:[%s2461_s0 + $0x70] sm:$0xff]  ;;  %v1847_v49 = vpack.c.bf16 %v1121_v44, %v1120_v43  ;;  %v1122_v50 = vld [vmem:[%s2460_s1 + $0xc0] sm:$0xff] }
   0xe   :  { %1784 = vmatprep.subr.bf16.mxu0 %v1783_v13  ;;  %1816 = vmatprep.subr.bf16.mxu1 %v1783_v13  ;;  %v1123_v51 = vld [vmem:[%s2460_s1 + $0xc8] sm:$0xff]  ;;  %v21_v52 = vld [vmem:[%s2461_s0 + $0x38] sm:$0xff]  ;;  %v1124_v55 = vld [vmem:[%s2460_s1 + $0xd0] sm:$0xff] }
   0xf   :  { %v29_v53 = vld [vmem:[%s2461_s0 + $0x78] sm:$0xff]  ;;  %v1851_v54 = vpack.c.bf16 %v1123_v51, %v1122_v50  ;;  %v1126_v58 = vld [vmem:[%s2460_s1 + $0xe0] sm:$0xff]  ;;  %v1127_v59 = vld [vmem:[%s2460_s1 + $0xe8] sm:$0xff] }
  0x10   :  { %v1125_v56 = vld [vmem:[%s2460_s1 + $0xd8] sm:$0xff]  ;;  %v1859_v60 = vpack.c.bf16 %v1127_v59, %v1126_v58  ;;  %v1128_v61 = vld [vmem:[%s2460_s1 + $0xf0] sm:$0xff]  ;;  %v1132_v0 = vld [vmem:[%s2460_s1 + $0x100] sm:$0xff] }
  0x11   :  { %1786 = vmatpush3.bf16.msra.mxu0 %v1783_v13  ;;  %1818 = vmatpush3.bf16.msra.mxu1 %v1783_v13  ;;  %v1855_v57 = vpack.c.bf16 %v1125_v56, %v1124_v55  ;;  %v1129_v62 = vld [vmem:[%s2460_s1 + $0xf8] sm:$0xff]  ;;  %v1133_v1 = vld [vmem:[%s2460_s1 + $0x108] sm:$0xff]  ;;  %v2232_v3 = vld [vmem:[%s2462_s2] ss:$0 sm:$0xff] }
  0x12   :  { %1788 = vmatprep.subr.bf16.mxu0 %v1787_v16  ;;  %1820 = vmatprep.subr.bf16.mxu1 %v1787_v16  ;;  %v1863_v63 = vpack.c.bf16 %v1129_v62, %v1128_v61  ;;  %v1899_v2 = vpack.c.bf16 %v1133_v1, %v1132_v0  ;;  %v1134_v10 = vld [vmem:[%s2460_s1 + $0x110] sm:$0xff]  ;;  %v1135_v11 = vld [vmem:[%s2460_s1 + $0x118] sm:$0xff]  ;;  %v1137_v26 = vld [vmem:[%s2460_s1 + $0x128] sm:$0xff] }
  0x13   :  { %v1903_v18 = vpack.c.bf16 %v1135_v11, %v1134_v10  ;;  %v1141_v58 = vld [vmem:[%s2460_s1 + $0x148] sm:$0xff]  ;;  %v1142_v0 = vld [vmem:[%s2460_s1 + $0x150] sm:$0xff]  ;;  %v1143_v1 = vld [vmem:[%s2460_s1 + $0x158] sm:$0xff] }
  0x14   :  { %v1151_v10 = vld [vmem:[%s2460_s1 + $0x188] sm:$0xff] }
  0x15   :  { %1790 = vmatpush3.bf16.msra.mxu0 %v1787_v16  ;;  %1822 = vmatpush3.bf16.msra.mxu1 %v1787_v16 }
  0x16   :  { %1792 = vmatprep.subr.bf16.mxu0 %v1791_v19  ;;  %1824 = vmatprep.subr.bf16.mxu1 %v1791_v19 }
  0x19   :  { %1794 = vmatpush3.bf16.msra.mxu0 %v1791_v19  ;;  %1826 = vmatpush3.bf16.msra.mxu1 %v1791_v19 }
  0x1a   :  { %1796 = vmatprep.subr.bf16.mxu0 %v1795_v22  ;;  %1828 = vmatprep.subr.bf16.mxu1 %v1795_v22 }
  0x1d   :  { %1798 = vmatpush3.bf16.msra.mxu0 %v1795_v22  ;;  %1830 = vmatpush3.bf16.msra.mxu1 %v1795_v22 }
  0x1e   :  { %1800 = vmatprep.subr.bf16.mxu0 %v1799_v25  ;;  %1832 = vmatprep.subr.bf16.mxu1 %v1799_v25 }
  0x21   :  { %1802 = vmatpush3.bf16.msra.mxu0 %v1799_v25  ;;  %1834 = vmatpush3.bf16.msra.mxu1 %v1799_v25  ;;  %v1136_v25 = vld [vmem:[%s2460_s1 + $0x120] sm:$0xff] }
  0x22   :  { %1836 = vmatprep.subr.bf16.mxu0 %v1835_v28  ;;  %1868 = vmatprep.subr.bf16.mxu1 %v1835_v28 }
  0x24   :  { %1435 = vmatmul.mubr.f32.vlgmr.msra.gmra.mrb[0].mxu0 %v15_v31  ;;  %1479 = vmatmul.mubr.f32.vlgmr.msra.gmra.mrb[0].mxu1 %v23_v32 }
  0x25   :  { %1437 = vmatprep.mubr.f32.mxu0 %v16_v33  ;;  %1481 = vmatprep.mubr.f32.mxu1 %v24_v34  ;;  %v1907_v33 = vpack.c.bf16 %v1137_v26, %v1136_v25 }
  0x26   :  { %1838 = vmatpush3.bf16.msra.mxu0 %v1835_v28  ;;  %1870 = vmatpush3.bf16.msra.mxu1 %v1835_v28 }
  0x27   :  { %1840 = vmatprep.subr.bf16.mxu0 %v1839_v35  ;;  %1872 = vmatprep.subr.bf16.mxu1 %v1839_v35 }
  0x28   :  { %1438 = vmatmul.mubr.f32.gmra.mrb[2].mxu0 %v17_v38  ;;  %1482 = vmatmul.mubr.f32.gmra.mrb[2].mxu1 %v25_v39 }
  0x29   :  { %1440 = vmatprep.mubr.f32.mxu0 %v18_v40  ;;  %1484 = vmatprep.mubr.f32.mxu1 %v26_v41  ;;  %v1138_v40 = vld [vmem:[%s2460_s1 + $0x130] sm:$0xff]  ;;  %v1139_v41 = vld [vmem:[%s2460_s1 + $0x138] sm:$0xff] }
  0x2a   :  { %1842 = vmatpush3.bf16.msra.mxu0 %v1839_v35  ;;  %1874 = vmatpush3.bf16.msra.mxu1 %v1839_v35 }
  0x2b   :  { %1844 = vmatprep.subr.bf16.mxu0 %v1843_v42  ;;  %1876 = vmatprep.subr.bf16.mxu1 %v1843_v42 }
  0x2c   :  { %1441 = vmatmul.mubr.f32.gmra.mrb[4].mxu0 %v19_v45  ;;  %1485 = vmatmul.mubr.f32.gmra.mrb[4].mxu1 %v27_v46 }
  0x2d   :  { %1443 = vmatprep.mubr.f32.mxu0 %v20_v47  ;;  %1487 = vmatprep.mubr.f32.mxu1 %v28_v48  ;;  %v1911_v48 = vpack.c.bf16 %v1139_v41, %v1138_v40 }
  0x2e   :  { %1846 = vmatpush3.bf16.msra.mxu0 %v1843_v42  ;;  %1878 = vmatpush3.bf16.msra.mxu1 %v1843_v42 }
  0x2f   :  { %1848 = vmatprep.subr.bf16.mxu0 %v1847_v49  ;;  %1880 = vmatprep.subr.bf16.mxu1 %v1847_v49 }
  0x30   :  { %1444 = vmatmul.mubr.f32.gmra.mrb[6].mxu0 %v21_v52  ;;  %1488 = vmatmul.mubr.f32.gmra.mrb[6].mxu1 %v29_v53 }
  0x32   :  { %1850 = vmatpush3.bf16.msra.mxu0 %v1847_v49  ;;  %1882 = vmatpush3.bf16.msra.mxu1 %v1847_v49 }
  0x33   :  { %1852 = vmatprep.subr.bf16.mxu0 %v1851_v54  ;;  %1884 = vmatprep.subr.bf16.mxu1 %v1851_v54 }
  0x36   :  { %1854 = vmatpush3.bf16.msra.mxu0 %v1851_v54  ;;  %1886 = vmatpush3.bf16.msra.mxu1 %v1851_v54 }
  0x37   :  { %1856 = vmatprep.subr.bf16.mxu0 %v1855_v57  ;;  %1888 = vmatprep.subr.bf16.mxu1 %v1855_v57 }
  0x3a   :  { %1858 = vmatpush3.bf16.msra.mxu0 %v1855_v57  ;;  %1890 = vmatpush3.bf16.msra.mxu1 %v1855_v57  ;;  %v1140_v57 = vld [vmem:[%s2460_s1 + $0x140] sm:$0xff] }
  0x3b   :  { %1860 = vmatprep.subr.bf16.mxu0 %v1859_v60  ;;  %1892 = vmatprep.subr.bf16.mxu1 %v1859_v60 }
  0x3e   :  { %1862 = vmatpush3.bf16.msra.mxu0 %v1859_v60  ;;  %1894 = vmatpush3.bf16.msra.mxu1 %v1859_v60 }
  0x3f   :  { %1864 = vmatprep.subr.bf16.mxu0 %v1863_v63  ;;  %1896 = vmatprep.subr.bf16.mxu1 %v1863_v63 }
  0x42   :  { %1866 = vmatpush3.bf16.msra.mxu0 %v1863_v63  ;;  %1898 = vmatpush3.bf16.msra.mxu1 %v1863_v63  ;;  %v1915_v63 = vpack.c.bf16 %v1141_v58, %v1140_v57 }
  0x43   :  { %1900 = vmatprep.subr.bf16.mxu0 %v1899_v2  ;;  %1932 = vmatprep.subr.bf16.mxu1 %v1899_v2 }
  0xf7   :  { %v1436_v4 = vpop.f32.mrb[0].mxu0  ;;  %v1480_v5 = vpop.f32.mrb[0].mxu1 }
  0xf8   :  { %v125_v6 = vadd.f32 %v1436_v4, %v2232_v3  ;;  %v238_v7 = vadd.f32 %v1480_v5, %v2232_v3  ;;  %v119_v8 = vpop.f32.mrb[1].mxu0  ;;  %v232_v9 = vpop.f32.mrb[1].mxu1  ;;  %v1145_v4 = vld [vmem:[%s2460_s1 + $0x168] sm:$0xff] }
  0xf9   :  { %v120_v12 = vadd.f32 %v2232_v3, %v119_v8  ;;  %v233_v13 = vadd.f32 %v2232_v3, %v232_v9  ;;  %v1150_v9 = vld [vmem:[%s2460_s1 + $0x180] sm:$0xff] }
  0xfa   :  { %v159_v19 = vmax.f32 %v125_v6, 0.0  ;;  %v272_v20 = vmax.f32 %v238_v7, 0.0  ;;  %v1146_v6 = vld [vmem:[%s2460_s1 + $0x170] sm:$0xff]  ;;  %v1147_v7 = vld [vmem:[%s2460_s1 + $0x178] sm:$0xff]  ;;  %v1963_v11 = vpack.c.bf16 %v1151_v10, %v1150_v9 }
  0xfb   :  { %v158_v14 = vmax.f32 %v120_v12, 0.0  ;;  %v271_v15 = vmax.f32 %v233_v13, 0.0  ;;  %v1439_v16 = vpop.f32.mrb[2].mxu0  ;;  %v1483_v17 = vpop.f32.mrb[2].mxu1  ;;  %v1927_v8 = vpack.c.bf16 %v1147_v7, %v1146_v6  ;;  %v1131_v12 = vld [vmem:[%s2462_s2 + $0x1] ss:$0 sm:$0xff] }
  0xfc   :  { %v135_v21 = vadd.f32 %v1439_v16, %v2232_v3  ;;  %v248_v22 = vadd.f32 %v1483_v17, %v2232_v3  ;;  %v129_v23 = vpop.f32.mrb[3].mxu0  ;;  %v242_v24 = vpop.f32.mrb[3].mxu1  ;;  %v1158_v6 = vld [vmem:[%s2460_s1 + $0x1c0] sm:$0xff]  ;;  %v1159_v7 = vld [vmem:[%s2460_s1 + $0x1c8] sm:$0xff]  ;;  %v1160_v9 = vld [vmem:[%s2460_s1 + $0x1d0] sm:$0xff] }
  0xfd   :  { %v130_v27 = vadd.f32 %v2232_v3, %v129_v23  ;;  %v243_v28 = vadd.f32 %v2232_v3, %v242_v24  ;;  %1522 = vmatprep.mubr.f32.mxu0 %v158_v14  ;;  %1566 = vmatprep.mubr.f32.mxu1 %v271_v15  ;;  %v1161_v10 = vld [vmem:[%s2460_s1 + $0x1d8] sm:$0xff] }
  0xfe   :  { %1523 = vmatmul.mubr.f32.vlgmr.msra.gmra.mrb[8].mxu0 %v159_v19  ;;  %1567 = vmatmul.mubr.f32.vlgmr.msra.gmra.mrb[8].mxu1 %v272_v20  ;;  %v161_v34 = vmax.f32 %v135_v21, 0.0  ;;  %v274_v35 = vmax.f32 %v248_v22, 0.0  ;;  %v1152_v19 = vld [vmem:[%s2460_s1 + $0x190] sm:$0xff]  ;;  %v1153_v20 = vld [vmem:[%s2460_s1 + $0x198] sm:$0xff] }
  0xff   :  { %v160_v29 = vmax.f32 %v130_v27, 0.0  ;;  %v273_v30 = vmax.f32 %v243_v28, 0.0  ;;  %v1442_v31 = vpop.f32.mrb[4].mxu0  ;;  %v1486_v32 = vpop.f32.mrb[4].mxu1  ;;  %1902 = vmatpush3.bf16.msra.mxu0 %v1899_v2  ;;  %1934 = vmatpush3.bf16.msra.mxu1 %v1899_v2  ;;  %v1919_v2 = vpack.c.bf16 %v1143_v1, %v1142_v0  ;;  %v1967_v27 = vpack.c.bf16 %v1153_v20, %v1152_v19  ;;  %v1154_v0 = vld [vmem:[%s2460_s1 + $0x1a0] sm:$0xff]  ;;  %v1155_v1 = vld [vmem:[%s2460_s1 + $0x1a8] sm:$0xff] }
 0x100   :  { %v145_v36 = vadd.f32 %v1442_v31, %v2232_v3  ;;  %v258_v37 = vadd.f32 %v1486_v32, %v2232_v3  ;;  %v139_v38 = vpop.f32.mrb[5].mxu0  ;;  %v252_v39 = vpop.f32.mrb[5].mxu1  ;;  %1904 = vmatprep.subr.bf16.mxu0 %v1903_v18  ;;  %1936 = vmatprep.subr.bf16.mxu1 %v1903_v18  ;;  %v1169_v19 = vld [vmem:[%s2460_s1 + $0x208] sm:$0xff]  ;;  %v1170_v20 = vld [vmem:[%s2460_s1 + $0x210] sm:$0xff] }
 0x101   :  { %v140_v42 = vadd.f32 %v2232_v3, %v139_v38  ;;  %v253_v43 = vadd.f32 %v2232_v3, %v252_v39  ;;  %1525 = vmatprep.mubr.f32.mxu0 %v160_v29  ;;  %1569 = vmatprep.mubr.f32.mxu1 %v273_v30 }
 0x102   :  { %1526 = vmatmul.mubr.f32.gmra.mrb[10].mxu0 %v161_v34  ;;  %1570 = vmatmul.mubr.f32.gmra.mrb[10].mxu1 %v274_v35  ;;  %v163_v49 = vmax.f32 %v145_v36, 0.0  ;;  %v276_v50 = vmax.f32 %v258_v37, 0.0 }
 0x103   :  { %v162_v44 = vmax.f32 %v140_v42, 0.0  ;;  %v275_v45 = vmax.f32 %v253_v43, 0.0  ;;  %v1445_v46 = vpop.f32.mrb[6].mxu0  ;;  %v1489_v47 = vpop.f32.mrb[6].mxu1  ;;  %1906 = vmatpush3.bf16.msra.mxu0 %v1903_v18  ;;  %1938 = vmatpush3.bf16.msra.mxu1 %v1903_v18 }
 0x104   :  { %v155_v51 = vadd.f32 %v1445_v46, %v2232_v3  ;;  %v268_v52 = vadd.f32 %v1489_v47, %v2232_v3  ;;  %v149_v53 = vpop.f32.mrb[7].mxu0  ;;  %v262_v54 = vpop.f32.mrb[7].mxu1  ;;  %1908 = vmatprep.subr.bf16.mxu0 %v1907_v33  ;;  %1940 = vmatprep.subr.bf16.mxu1 %v1907_v33 }
 0x105   :  { %v150_v55 = vadd.f32 %v2232_v3, %v149_v53  ;;  %v263_v56 = vadd.f32 %v2232_v3, %v262_v54  ;;  %1528 = vmatprep.mubr.f32.mxu0 %v162_v44  ;;  %1572 = vmatprep.mubr.f32.mxu1 %v275_v45  ;;  %v1144_v3 = vld [vmem:[%s2460_s1 + $0x160] sm:$0xff] }
 0x106   :  { %1529 = vmatmul.mubr.f32.gmra.mrb[12].mxu0 %v163_v49  ;;  %1573 = vmatmul.mubr.f32.gmra.mrb[12].mxu1 %v276_v50  ;;  %v165_v61 = vmax.f32 %v155_v51, 0.0  ;;  %v278_v62 = vmax.f32 %v268_v52, 0.0  ;;  %v1923_v5 = vpack.c.bf16 %v1145_v4, %v1144_v3  ;;  %v1156_v3 = vld [vmem:[%s2460_s1 + $0x1b0] sm:$0xff]  ;;  %v1157_v4 = vld [vmem:[%s2460_s1 + $0x1b8] sm:$0xff] }
 0x107   :  { %v164_v59 = vmax.f32 %v150_v55, 0.0  ;;  %v277_v60 = vmax.f32 %v263_v56, 0.0  ;;  %1910 = vmatpush3.bf16.msra.mxu0 %v1907_v33  ;;  %1942 = vmatpush3.bf16.msra.mxu1 %v1907_v33 }
 0x108   :  { %1912 = vmatprep.subr.bf16.mxu0 %v1911_v48  ;;  %1944 = vmatprep.subr.bf16.mxu1 %v1911_v48 }
 0x109   :  { %1531 = vmatprep.mubr.f32.mxu0 %v164_v59  ;;  %1575 = vmatprep.mubr.f32.mxu1 %v277_v60 }
 0x10a   :  { %1532 = vmatmul.mubr.f32.gmra.mrb[14].mxu0 %v165_v61  ;;  %1576 = vmatmul.mubr.f32.gmra.mrb[14].mxu1 %v278_v62 }
 0x10b   :  { %1914 = vmatpush3.bf16.msra.mxu0 %v1911_v48  ;;  %1946 = vmatpush3.bf16.msra.mxu1 %v1911_v48 }
 0x10c   :  { %1916 = vmatprep.subr.bf16.mxu0 %v1915_v63  ;;  %1948 = vmatprep.subr.bf16.mxu1 %v1915_v63 }
 0x10f   :  { %1918 = vmatpush3.bf16.msra.mxu0 %v1915_v63  ;;  %1950 = vmatpush3.bf16.msra.mxu1 %v1915_v63 }
 0x110   :  { %1920 = vmatprep.subr.bf16.mxu0 %v1919_v2  ;;  %1952 = vmatprep.subr.bf16.mxu1 %v1919_v2 }
 0x113   :  { %1922 = vmatpush3.bf16.msra.mxu0 %v1919_v2  ;;  %1954 = vmatpush3.bf16.msra.mxu1 %v1919_v2  ;;  %v1971_v2 = vpack.c.bf16 %v1155_v1, %v1154_v0 }
 0x114   :  { %1924 = vmatprep.subr.bf16.mxu0 %v1923_v5  ;;  %1956 = vmatprep.subr.bf16.mxu1 %v1923_v5 }
 0x117   :  { %1926 = vmatpush3.bf16.msra.mxu0 %v1923_v5  ;;  %1958 = vmatpush3.bf16.msra.mxu1 %v1923_v5  ;;  %v1975_v5 = vpack.c.bf16 %v1157_v4, %v1156_v3 }
 0x118   :  { %1928 = vmatprep.subr.bf16.mxu0 %v1927_v8  ;;  %1960 = vmatprep.subr.bf16.mxu1 %v1927_v8 }
 0x11b   :  { %1930 = vmatpush3.bf16.msra.mxu0 %v1927_v8  ;;  %1962 = vmatpush3.bf16.msra.mxu1 %v1927_v8  ;;  %v1979_v8 = vpack.c.bf16 %v1159_v7, %v1158_v6 }
 0x11c   :  { %1964 = vmatprep.subr.bf16.mxu0 %v1963_v11 }
 0x1d1   :  { %v1524_v13 = vpop.f32.mrb[8].mxu0  ;;  %v1568_v14 = vpop.f32.mrb[8].mxu1 }
 0x1d2   :  { %v376_v15 = vadd.f32 %v1524_v13, %v1131_v12  ;;  %v489_v16 = vadd.f32 %v1568_v14, %v1131_v12  ;;  %v370_v17 = vpop.f32.mrb[9].mxu0  ;;  %v483_v18 = vpop.f32.mrb[9].mxu1  ;;  %v1163_v13 = vld [vmem:[%s2460_s1 + $0x1e8] sm:$0xff] }
 0x1d3   :  { %v371_v21 = vadd.f32 %v1131_v12, %v370_v17  ;;  %v484_v22 = vadd.f32 %v1131_v12, %v483_v18  ;;  %v1168_v18 = vld [vmem:[%s2460_s1 + $0x200] sm:$0xff] }
 0x1d4   :  { %v410_v28 = vmax.f32 %v376_v15, 0.0  ;;  %v523_v29 = vmax.f32 %v489_v16, 0.0  ;;  %v1164_v15 = vld [vmem:[%s2460_s1 + $0x1f0] sm:$0xff]  ;;  %v1165_v16 = vld [vmem:[%s2460_s1 + $0x1f8] sm:$0xff] }
 0x1d5   :  { %v409_v23 = vmax.f32 %v371_v21, 0.0  ;;  %v522_v24 = vmax.f32 %v484_v22, 0.0  ;;  %v1527_v25 = vpop.f32.mrb[10].mxu0  ;;  %v1571_v26 = vpop.f32.mrb[10].mxu1  ;;  %v1991_v17 = vpack.c.bf16 %v1165_v16, %v1164_v15  ;;  %v1995_v21 = vpack.c.bf16 %v1169_v19, %v1168_v18  ;;  %v1171_v22 = vld [vmem:[%s2460_s1 + $0x218] sm:$0xff] }
 0x1d6   :  { %v386_v30 = vadd.f32 %v1527_v25, %v1131_v12  ;;  %v499_v31 = vadd.f32 %v1571_v26, %v1131_v12  ;;  %v380_v32 = vpop.f32.mrb[11].mxu0  ;;  %v493_v33 = vpop.f32.mrb[11].mxu1  ;;  %v1173_v25 = vld [vmem:[%s2460_s1 + $0x228] sm:$0xff] }
 0x1d7   :  { %v381_v34 = vadd.f32 %v1131_v12, %v380_v32  ;;  %v494_v35 = vadd.f32 %v1131_v12, %v493_v33  ;;  %1610 = vmatprep.mubr.f32.mxu0 %v409_v23  ;;  %1654 = vmatprep.mubr.f32.mxu1 %v522_v24  ;;  %v1999_v23 = vpack.c.bf16 %v1171_v22, %v1170_v20  ;;  %v1172_v24 = vld [vmem:[%s2460_s1 + $0x220] sm:$0xff]  ;;  %v1178_v33 = vld [vmem:[%s2460_s1 + $0x250] sm:$0xff] }
 0x1d8   :  { %1611 = vmatmul.mubr.f32.vlgmr.msra.gmra.mrb[16].mxu0 %v410_v28  ;;  %1655 = vmatmul.mubr.f32.vlgmr.msra.gmra.mrb[16].mxu1 %v523_v29  ;;  %v412_v40 = vmax.f32 %v386_v30, 0.0  ;;  %v525_v41 = vmax.f32 %v499_v31, 0.0  ;;  %v2003_v26 = vpack.c.bf16 %v1173_v25, %v1172_v24  ;;  %v1175_v28 = vld [vmem:[%s2460_s1 + $0x238] sm:$0xff]  ;;  %v1176_v30 = vld [vmem:[%s2460_s1 + $0x240] sm:$0xff]  ;;  %v1177_v31 = vld [vmem:[%s2460_s1 + $0x248] sm:$0xff] }
 0x1d9   :  { %v411_v36 = vmax.f32 %v381_v34, 0.0  ;;  %v524_v37 = vmax.f32 %v494_v35, 0.0  ;;  %v1530_v38 = vpop.f32.mrb[12].mxu0  ;;  %v1574_v39 = vpop.f32.mrb[12].mxu1  ;;  %1966 = vmatpush3.bf16.msra.mxu0 %v1963_v11  ;;  %v1983_v11 = vpack.c.bf16 %v1161_v10, %v1160_v9  ;;  %1996 = vmatprep.subr.bf16.mxu1 %v1995_v21  ;;  %v2011_v32 = vpack.c.bf16 %v1177_v31, %v1176_v30  ;;  %v1179_v34 = vld [vmem:[%s2460_s1 + $0x258] sm:$0xff] }
 0x1da   :  { %v396_v42 = vadd.f32 %v1530_v38, %v1131_v12  ;;  %v509_v43 = vadd.f32 %v1574_v39, %v1131_v12  ;;  %v390_v44 = vpop.f32.mrb[13].mxu0  ;;  %v503_v45 = vpop.f32.mrb[13].mxu1  ;;  %1968 = vmatprep.subr.bf16.mxu0 %v1967_v27  ;;  %1998 = vmatpush3.bf16.msra.mxu1 %v1995_v21  ;;  %v2015_v35 = vpack.c.bf16 %v1179_v34, %v1178_v33 }
 0x1db   :  { %v391_v46 = vadd.f32 %v1131_v12, %v390_v44  ;;  %v504_v47 = vadd.f32 %v1131_v12, %v503_v45  ;;  %1613 = vmatprep.mubr.f32.mxu0 %v411_v36  ;;  %1657 = vmatprep.mubr.f32.mxu1 %v524_v37  ;;  %v1180_v36 = vld [vmem:[%s2460_s1 + $0x260] sm:$0xff]  ;;  %v1181_v37 = vld [vmem:[%s2460_s1 + $0x268] sm:$0xff] }
 0x1dc   :  { %1614 = vmatmul.mubr.f32.gmra.mrb[18].mxu0 %v412_v40  ;;  %1658 = vmatmul.mubr.f32.gmra.mrb[18].mxu1 %v525_v41  ;;  %v414_v52 = vmax.f32 %v396_v42, 0.0  ;;  %v527_v53 = vmax.f32 %v509_v43, 0.0  ;;  %v2019_v38 = vpack.c.bf16 %v1181_v37, %v1180_v36  ;;  %v1149_v43 = vld [vmem:[%s2462_s2 + $0x2] ss:$0 sm:$0xff] }
 0x1dd   :  { %v413_v48 = vmax.f32 %v391_v46, 0.0  ;;  %v526_v49 = vmax.f32 %v504_v47, 0.0  ;;  %v1533_v50 = vpop.f32.mrb[14].mxu0  ;;  %v1577_v51 = vpop.f32.mrb[14].mxu1  ;;  %1970 = vmatpush3.bf16.msra.mxu0 %v1967_v27  ;;  %2000 = vmatprep.subr.bf16.mxu1 %v1999_v23  ;;  %v1174_v27 = vld [vmem:[%s2460_s1 + $0x230] sm:$0xff] }
 0x1de   :  { %v406_v54 = vadd.f32 %v1533_v50, %v1131_v12  ;;  %v519_v55 = vadd.f32 %v1577_v51, %v1131_v12  ;;  %v400_v56 = vpop.f32.mrb[15].mxu0  ;;  %v513_v57 = vpop.f32.mrb[15].mxu1  ;;  %1972 = vmatprep.subr.bf16.mxu0 %v1971_v2  ;;  %2002 = vmatpush3.bf16.msra.mxu1 %v1999_v23  ;;  %v2007_v29 = vpack.c.bf16 %v1175_v28, %v1174_v27 }
 0x1df   :  { %v401_v58 = vadd.f32 %v1131_v12, %v400_v56  ;;  %v514_v59 = vadd.f32 %v1131_v12, %v513_v57  ;;  %1616 = vmatprep.mubr.f32.mxu0 %v413_v48  ;;  %1660 = vmatprep.mubr.f32.mxu1 %v526_v49  ;;  %v1162_v12 = vld [vmem:[%s2460_s1 + $0x1e0] sm:$0xff] }
 0x1e0   :  { %1617 = vmatmul.mubr.f32.gmra.mrb[20].mxu0 %v414_v52  ;;  %1661 = vmatmul.mubr.f32.gmra.mrb[20].mxu1 %v527_v53  ;;  %v416_v62 = vmax.f32 %v406_v54, 0.0  ;;  %v529_v63 = vmax.f32 %v519_v55, 0.0  ;;  %v1987_v14 = vpack.c.bf16 %v1163_v13, %v1162_v12 }
 0x1e1   :  { %v415_v60 = vmax.f32 %v401_v58, 0.0  ;;  %v528_v61 = vmax.f32 %v514_v59, 0.0  ;;  %1974 = vmatpush3.bf16.msra.mxu0 %v1971_v2  ;;  %2004 = vmatprep.subr.bf16.mxu1 %v2003_v26 }
 0x1e2   :  { %1976 = vmatprep.subr.bf16.mxu0 %v1975_v5  ;;  %2006 = vmatpush3.bf16.msra.mxu1 %v2003_v26 }
 0x1e3   :  { %1619 = vmatprep.mubr.f32.mxu0 %v415_v60  ;;  %1663 = vmatprep.mubr.f32.mxu1 %v528_v61 }
 0x1e4   :  { %1620 = vmatmul.mubr.f32.gmra.mrb[22].mxu0 %v416_v62  ;;  %1664 = vmatmul.mubr.f32.gmra.mrb[22].mxu1 %v529_v63 }
 0x1e5   :  { %1978 = vmatpush3.bf16.msra.mxu0 %v1975_v5  ;;  %2008 = vmatprep.subr.bf16.mxu1 %v2007_v29 }
 0x1e6   :  { %1980 = vmatprep.subr.bf16.mxu0 %v1979_v8  ;;  %2010 = vmatpush3.bf16.msra.mxu1 %v2007_v29 }
 0x1e7   :  { %2012 = vmatprep.subr.bf16.mxu1 %v2011_v32 }
 0x1e9   :  { %1982 = vmatpush3.bf16.msra.mxu0 %v1979_v8 }
 0x1ea   :  { %1984 = vmatprep.subr.bf16.mxu0 %v1983_v11  ;;  %2014 = vmatpush3.bf16.msra.mxu1 %v2011_v32 }
 0x1eb   :  { %2016 = vmatprep.subr.bf16.mxu1 %v2015_v35 }
 0x1ed   :  { %1986 = vmatpush3.bf16.msra.mxu0 %v1983_v11 }
 0x1ee   :  { %1988 = vmatprep.subr.bf16.mxu0 %v1987_v14  ;;  %2018 = vmatpush3.bf16.msra.mxu1 %v2015_v35 }
 0x1ef   :  { %2020 = vmatprep.subr.bf16.mxu1 %v2019_v38 }
 0x1f1   :  { %1990 = vmatpush3.bf16.msra.mxu0 %v1987_v14 }
 0x1f2   :  { %1992 = vmatprep.subr.bf16.mxu0 %v1991_v17  ;;  %2022 = vmatpush3.bf16.msra.mxu1 %v2019_v38  ;;  %v1182_v38 = vld [vmem:[%s2460_s1 + $0x270] sm:$0xff] }
 0x1f5   :  { %1994 = vmatpush3.bf16.msra.mxu0 %v1991_v17 }
 0x2ab   :  { %v1612_v39 = vpop.f32.mrb[16].mxu0  ;;  %v1656_v40 = vpop.f32.mrb[16].mxu1 }
 0x2ac   :  { %v621_v41 = vpop.f32.mrb[17].mxu0  ;;  %v734_v42 = vpop.f32.mrb[17].mxu1  ;;  %v627_v46 = vadd.f32 %v1612_v39, %v1149_v43  ;;  %v740_v47 = vadd.f32 %v1656_v40, %v1149_v43  ;;  %v1183_v39 = vld [vmem:[%s2460_s1 + $0x278] sm:$0xff] }
 0x2ad   :  { %v622_v50 = vadd.f32 %v1149_v43, %v621_v41  ;;  %v735_v51 = vadd.f32 %v1149_v43, %v734_v42  ;;  %v2023_v40 = vpack.c.bf16 %v1183_v39, %v1182_v38  ;;  %v1186_v41 = vld [vmem:[%s2460_s1 + $0x280] sm:$0xff]  ;;  %v1187_v42 = vld [vmem:[%s2460_s1 + $0x288] sm:$0xff] }
 0x2ae   :  { %v661_v54 = vmax.f32 %v627_v46, 0.0  ;;  %v774_v55 = vmax.f32 %v740_v47, 0.0  ;;  %v1190_v47 = vld [vmem:[%s2460_s1 + $0x2a0] sm:$0xff] }
 0x2af   :  { %v1615_v44 = vpop.f32.mrb[18].mxu0  ;;  %v1659_v45 = vpop.f32.mrb[18].mxu1  ;;  %v660_v60 = vmax.f32 %v622_v50, 0.0  ;;  %v773_v61 = vmax.f32 %v735_v51, 0.0  ;;  %2024 = vmatprep.subr.bf16.mxu1 %v2023_v40  ;;  %v1192_v50 = vld [vmem:[%s2460_s1 + $0x2b0] sm:$0xff]  ;;  %v1193_v51 = vld [vmem:[%s2460_s1 + $0x2b8] sm:$0xff] }
 0x2b0   :  { %v631_v48 = vpop.f32.mrb[19].mxu0  ;;  %v744_v49 = vpop.f32.mrb[19].mxu1  ;;  %v637_v0 = vadd.f32 %v1615_v44, %v1149_v43  ;;  %v750_v1 = vadd.f32 %v1659_v45, %v1149_v43  ;;  %2026 = vmatpush3.bf16.msra.mxu1 %v2023_v40  ;;  %v2027_v44 = vpack.c.bf16 %v1187_v42, %v1186_v41  ;;  %v1189_v45 = vld [vmem:[%s2460_s1 + $0x298] sm:$0xff] }
 0x2b1   :  { %v632_v4 = vadd.f32 %v1149_v43, %v631_v48  ;;  %v745_v5 = vadd.f32 %v1149_v43, %v744_v49  ;;  %v1191_v48 = vld [vmem:[%s2460_s1 + $0x2a8] sm:$0xff] }
 0x2b2   :  { %v663_v20 = vmax.f32 %v637_v0, 0.0  ;;  %v776_v21 = vmax.f32 %v750_v1, 0.0  ;;  %2028 = vmatprep.subr.bf16.mxu0 %v2027_v44  ;;  %v2035_v49 = vpack.c.bf16 %v1191_v48, %v1190_v47 }
 0x2b3   :  { %v1618_v52 = vpop.f32.mrb[20].mxu0  ;;  %v1662_v53 = vpop.f32.mrb[20].mxu1  ;;  %v662_v24 = vmax.f32 %v632_v4, 0.0  ;;  %v775_v25 = vmax.f32 %v745_v5, 0.0  ;;  %v1200_v5 = vld [vmem:[%s2460_s1 + $0x2f0] sm:$0xff] }
 0x2b4   :  { %v647_v56 = vadd.f32 %v1618_v52, %v1149_v43  ;;  %v760_v57 = vadd.f32 %v1662_v53, %v1149_v43  ;;  %v641_v58 = vpop.f32.mrb[21].mxu0  ;;  %v754_v59 = vpop.f32.mrb[21].mxu1  ;;  %v2039_v52 = vpack.c.bf16 %v1193_v51, %v1192_v50  ;;  %v1194_v53 = vld [vmem:[%s2460_s1 + $0x2c0] sm:$0xff] }
 0x2b5   :  { %v642_v62 = vadd.f32 %v1149_v43, %v641_v58  ;;  %v755_v63 = vadd.f32 %v1149_v43, %v754_v59  ;;  %v1198_v59 = vld [vmem:[%s2460_s1 + $0x2e0] sm:$0xff] }
 0x2b6   :  { %v665_v2 = vmax.f32 %v647_v56, 0.0  ;;  %v778_v3 = vmax.f32 %v760_v57, 0.0  ;;  %v1196_v56 = vld [vmem:[%s2460_s1 + $0x2d0] sm:$0xff]  ;;  %v1197_v57 = vld [vmem:[%s2460_s1 + $0x2d8] sm:$0xff] }
 0x2b7   :  { %v664_v6 = vmax.f32 %v642_v62, 0.0  ;;  %v777_v7 = vmax.f32 %v755_v63, 0.0  ;;  %v1621_v8 = vpop.f32.mrb[22].mxu0  ;;  %v1665_v9 = vpop.f32.mrb[22].mxu1  ;;  %v2047_v58 = vpack.c.bf16 %v1197_v57, %v1196_v56  ;;  %v1167_v62 = vld [vmem:[%s2462_s2 + $0x3] ss:$0 sm:$0xff] }
 0x2b8   :  { %v782_v10 = vmax.f32 %v661_v54, %v665_v2  ;;  %v788_v11 = vmax.f32 %v774_v55, %v778_v3  ;;  %v657_v12 = vadd.f32 %v1621_v8, %v1149_v43  ;;  %v770_v13 = vadd.f32 %v1665_v9, %v1149_v43  ;;  %v651_v14 = vpop.f32.mrb[23].mxu0  ;;  %v764_v15 = vpop.f32.mrb[23].mxu1  ;;  %v1195_v54 = vld [vmem:[%s2460_s1 + $0x2c8] sm:$0xff]  ;;  %v1185_v8 = vld [vmem:[%s2462_s2 + $0x4] ss:$0 sm:$0xff] }
 0x2b9   :  { %v781_v16 = vmax.f32 %v660_v60, %v664_v6  ;;  %v787_v17 = vmax.f32 %v773_v61, %v777_v7  ;;  %v652_v18 = vadd.f32 %v1149_v43, %v651_v14  ;;  %v765_v19 = vadd.f32 %v1149_v43, %v764_v15  ;;  %v1188_v43 = vld [vmem:[%s2460_s1 + $0x290] sm:$0xff]  ;;  %v1199_v60 = vld [vmem:[%s2460_s1 + $0x2e8] sm:$0xff]  ;;  %v1201_v6 = vld [vmem:[%s2460_s1 + $0x2f8] sm:$0xff] }
 0x2ba   :  { %v667_v22 = vmax.f32 %v657_v12, 0.0  ;;  %v780_v23 = vmax.f32 %v770_v13, 0.0  ;;  %v2031_v46 = vpack.c.bf16 %v1189_v45, %v1188_v43  ;;  %v2043_v55 = vpack.c.bf16 %v1195_v54, %v1194_v53  ;;  %v1203_v15 = vld [vmem:[%s2462_s2 + $0x5] ss:$0 sm:$0xff] }
 0x2bb   :  { %v666_v26 = vmax.f32 %v652_v18, 0.0  ;;  %v779_v27 = vmax.f32 %v765_v19, 0.0  ;;  %v2051_v61 = vpack.c.bf16 %v1199_v60, %v1198_v59  ;;  %v2055_v7 = vpack.c.bf16 %v1201_v6, %v1200_v5 }
 0x2bc   :  { %v784_v28 = vmax.f32 %v663_v20, %v667_v22  ;;  %v790_v29 = vmax.f32 %v776_v21, %v780_v23 }
 0x2bd   :  { %v783_v30 = vmax.f32 %v662_v24, %v666_v26  ;;  %v789_v31 = vmax.f32 %v775_v25, %v779_v27 }
 0x2be   :  { %v786_v32 = vmax.f32 %v782_v10, %v784_v28  ;;  %v792_v33 = vmax.f32 %v788_v11, %v790_v29 }
 0x2bf   :  { %v785_v34 = vmax.f32 %v781_v16, %v783_v30  ;;  %v791_v35 = vmax.f32 %v787_v17, %v789_v31 }
 0x2c0   :  { %v794_v36 = vmax.f32 %v786_v32, %v792_v33 }
 0x2c1   :  { %v793_v37 = vmax.f32 %v785_v34, %v791_v35 }
 0x2c3   :  { %1698 = vmatprep.mubr.f32.mxu0 %v793_v37 }
 0x2c4   :  { %1699 = vmatmul.mubr.f32.vlgmr.msra.gmra.mrb[24].mxu0 %v794_v36 }
 0x2c5   :  { %2030 = vmatpush3.bf16.msra.mxu0 %v2027_v44 }
 0x2c6   :  { %2032 = vmatprep.subr.bf16.mxu0 %v2031_v46 }
 0x2c9   :  { %2034 = vmatpush3.bf16.msra.mxu0 %v2031_v46 }
 0x2ca   :  { %2036 = vmatprep.subr.bf16.mxu0 %v2035_v49 }
 0x2cd   :  { %2038 = vmatpush3.bf16.msra.mxu0 %v2035_v49 }
 0x2ce   :  { %2040 = vmatprep.subr.bf16.mxu0 %v2039_v52 }
 0x2d1   :  { %2042 = vmatpush3.bf16.msra.mxu0 %v2039_v52 }
 0x2d2   :  { %2044 = vmatprep.subr.bf16.mxu0 %v2043_v55 }
 0x2d5   :  { %2046 = vmatpush3.bf16.msra.mxu0 %v2043_v55 }
 0x2d6   :  { %2048 = vmatprep.subr.bf16.mxu0 %v2047_v58 }
 0x2d9   :  { %2050 = vmatpush3.bf16.msra.mxu0 %v2047_v58 }
 0x2da   :  { %2052 = vmatprep.subr.bf16.mxu0 %v2051_v61 }
 0x2dd   :  { %2054 = vmatpush3.bf16.msra.mxu0 %v2051_v61 }
 0x2de   :  { %2056 = vmatprep.subr.bf16.mxu0 %v2055_v7 }
 0x2e1   :  { %2058 = vmatpush3.bf16.msra.mxu0 %v2055_v7 }
 0x397   :  { %v1700_v63 = vpop.f32.mrb[24].mxu0 }
 0x398   :  { %v892_v0 = vadd.f32 %v1700_v63, %v1167_v62  ;;  %v886_v1 = vpop.f32.mrb[25].mxu0 }
 0x399   :  { %v887_v2 = vadd.f32 %v1167_v62, %v886_v1 }
 0x39a   :  { %v896_v4 = vmax.f32 %v892_v0, 0.0 }
 0x39b   :  { %v895_v3 = vmax.f32 %v887_v2, 0.0 }
 0x39d   :  { %1733 = vmatprep.mubr.f32.mxu1 %v895_v3 }
 0x39e   :  { %1734 = vmatmul.mubr.f32.vlgmr.msra.gmra.mrb[24].mxu1 %v896_v4 }
 0x471   :  { %v1735_v9 = vpop.f32.mrb[24].mxu1 }
 0x472   :  { %v994_v10 = vadd.f32 %v1735_v9, %v1185_v8  ;;  %v988_v11 = vpop.f32.mrb[25].mxu1 }
 0x473   :  { %v989_v12 = vadd.f32 %v1185_v8, %v988_v11 }
 0x474   :  { %v998_v14 = vmax.f32 %v994_v10, 0.0 }
 0x475   :  { %v997_v13 = vmax.f32 %v989_v12, 0.0 }
 0x477   :  { %1768 = vmatprep.mubr.f32.mxu0 %v997_v13 }
 0x478   :  { %1769 = vmatmul.mubr.f32.vlgmr.msra.gmra.mrb[26].mxu0 %v998_v14 }
 0x54b   :  { %v1770_v16 = vpop.f32.mrb[26].mxu0 }
 0x54c   :  { %v1096_v17 = vadd.f32 %v1770_v16, %v1203_v15  ;;  %v1090_v18 = vpop.f32.mrb[27].mxu0 }
 0x54d   :  { %v1091_v19 = vadd.f32 %v1203_v15, %v1090_v18 }
 0x54e   :  { %1100 = vst [vmem:[%s2463_s3 + $0x8] sm:$0xff] %v1096_v17 }
 0x54f   :  { %1099 = vst [vmem:[%s2463_s3] sm:$0xff] %v1091_v19  ;;  %v1101_v20 = vmax.f32 %v1091_v19, %v1096_v17 }
 0x551   :  { %v1102_v21 = vrot.slane %v1101_v20, 4 }
 0x553   :  { %v1103_v22 = vmax.f32 %v1101_v20, %v1102_v21 }
 0x555   :  { %v1104_v23 = vrot.slane %v1103_v22, 2 }
 0x557   :  { %v1105_v24 = vmax.f32 %v1103_v22, %v1104_v23 }
 0x559   :  { %v1106_v25 = vrot.slane %v1105_v24, 1 }
 0x55b   :  { %v1107_v26 = vmax.f32 %v1105_v24, %v1106_v25 }
 0x55d   :  { %1108 = vst [vmem:[%s2463_s3 + $0x10] sm:$0x1] %v1107_v26 }

</bundles_post_ra>
